<compile_context>
chip_gen: v7x
topology: tpu7x:2x2x1
jax: 0.10.0
libtpu: 0.0.40
codegen_flags: <defaults>
</compile_context>

<pallas_src>
import jax
import jax.numpy as jnp
from jax import lax
from jax.experimental import pallas as pl
from jax.experimental.pallas import tpu as pltpu

_SUBLANE = 8
_UNROLL_V_MAX = 64                    # static unroll up to this V, fori_loop beyond
_VMEM_LIMIT = 48 * 1024 * 1024        # stays under v7x's 64 MiB physical VMEM
_VMEM_TILE_BUDGET = 36 * 1024 * 1024  # headroom below the limit for tile sizing


def _greedy_kernel(w_ref, seq_ref, negsize_ref):
    # w_ref:       (TB, V, U) input dtype; edge weights for this batch tile
    # seq_ref:     (TB, V)    i32;  selected u index per v step (0 = skip)
    # negsize_ref: (TB, 1)    f32;  -(accumulated matching size)
    TB, V, U = w_ref.shape

    # Hoisted lane iota (broadcasts are not CSE'd inside loops).
    ucols = lax.broadcasted_iota(jnp.int32, (TB, U), 1)

    def step(wv, matched, size):
        # wv: (TB, U) f32 weights of the arriving v node.
        wm = jnp.where(matched, -1.0, wv)                    # mask matched u's with -1
        maxu = jnp.max(wm, axis=-1, keepdims=True)           # (TB, 1)
        first = jnp.min(jnp.where(wm == maxu, ucols, U),
                        axis=-1, keepdims=True)              # first argmax (ties -> low idx)
        take = maxu > 0.0                                    # skip (weight 0) wins ties at 0
        sel = jnp.where(take, first + 1, 0)                  # 0 = skip, else 1-based u index
        size = size + jnp.maximum(maxu, 0.0)                 # gain == selected weight
        matched = jnp.logical_or(matched,
                                 jnp.logical_and(ucols == first, take))
        return matched, size, sel

    matched0 = jnp.zeros((TB, U), dtype=jnp.bool_)
    size0 = jnp.zeros((TB, 1), dtype=jnp.float32)

    if V <= _UNROLL_V_MAX:
        matched, size = matched0, size0
        for v in range(V):                                   # static unroll
            wv = w_ref[:, v, :].astype(jnp.float32)          # (TB, U), batch on sublanes
            matched, size, sel = step(wv, matched, size)
            seq_ref[:, v:v + 1] = sel                        # O(1) column store per step
    else:
        def body(v, carry):
            matched, size = carry
            wv = w_ref[:, pl.ds(v, 1), :][:, 0, :].astype(jnp.float32)
            matched, size, sel = step(wv, matched, size)
            seq_ref[:, pl.ds(v, 1)] = sel
            return matched, size
        _, size = lax.fori_loop(0, V, body, (matched0, size0))

    negsize_ref[...] = -size


def _pick_tb(padded_batch, v_size, u_size, in_itemsize):
    """Largest sublane-aligned batch tile whose double-buffered blocks fit VMEM."""
    per_row = 2 * v_size * u_size * in_itemsize + 2 * (v_size + 1) * 4
    tb = _VMEM_TILE_BUDGET // max(per_row, 1)
    tb = (tb // _SUBLANE) * _SUBLANE
    tb = max(_SUBLANE, min(tb, padded_batch))
    # Prefer >= 2 grid steps: keeps the auto-pipeline busy and shards the
    # "parallel" batch axis across both TensorCores on v7x.
    if padded_batch >= 2 * _SUBLANE and tb > padded_batch // 2:
        tb = max(_SUBLANE, (padded_batch // 2 // _SUBLANE) * _SUBLANE)
    return tb


def greedy_forward(weights):
    """weights: (batch, v_size, u_size) float edge weights.

    Returns:
      neg_size:  (batch, 1) float32    == -state.size
      sequences: (batch, v_size) int32 (0 = skip, k = matched to u node k)
    """
    batch, v_size, u_size = weights.shape
    padded = -(-batch // _SUBLANE) * _SUBLANE
    tb = _pick_tb(padded, v_size, u_size, weights.dtype.itemsize)
    padded = -(-padded // tb) * tb

    w = weights
    if padded != batch:
        # Zero-padded rows select skip everywhere (size 0); sliced off below.
        w = jnp.concatenate(
            [w, jnp.zeros((padded - batch, v_size, u_size), w.dtype)], axis=0)

    seq, neg = pl.pallas_call(
        _greedy_kernel,
        out_shape=(
            jax.ShapeDtypeStruct((padded, v_size), jnp.int32),
            jax.ShapeDtypeStruct((padded, 1), jnp.float32),
        ),
        grid=(padded // tb,),
        in_specs=[pl.BlockSpec((tb, v_size, u_size), lambda b: (b, 0, 0))],
        out_specs=(
            pl.BlockSpec((tb, v_size), lambda b: (b, 0)),
            pl.BlockSpec((tb, 1), lambda b: (b, 0)),
        ),
        compiler_params=pltpu.CompilerParams(
            dimension_semantics=("parallel",),
            vmem_limit_bytes=_VMEM_LIMIT,
        ),
    )(w)

    return neg[:batch], seq[:batch]


def _greedy_reference(weights):
    """Pure-JAX reference mirroring the PyTorch while-loop."""
    batch, v_size, u_size = weights.shape
    U = u_size + 1
    w_full = jnp.concatenate(
        [jnp.zeros((batch, v_size, 1), weights.dtype), weights], axis=-1)
    mask = jnp.zeros((batch, U), jnp.float32)
    size = jnp.zeros((batch, 1), jnp.float32)
    seqs = []
    for v in range(v_size):
        w = jnp.where(mask > 0.5, -1.0, w_full[:, v, :])
        sel = jnp.argmax(w, axis=-1).astype(jnp.int32)
        gain = jnp.take_along_axis(w, sel[:, None], axis=-1)
        size = size + gain
        oh = jax.nn.one_hot(sel, U, dtype=jnp.float32)
        oh = oh.at[:, 0].set(0.0)
        mask = jnp.maximum(mask, oh)
        seqs.append(sel)
    return -size, jnp.stack(seqs, axis=1)


if __name__ == "__main__":
    key = jax.random.PRNGKey(0)
    batch, u_size, v_size = 2, 8, 8
    # edge weights of the bipartite graph (batch, v_size, u_size)
    x = jax.random.uniform(key, (batch, v_size, u_size), dtype=jnp.float32)

    neg_size, sequences = greedy_forward(x)
    jax.block_until_ready((neg_size, sequences))

    ref_neg_size, ref_sequences = _greedy_reference(x)
    assert jnp.allclose(neg_size, ref_neg_size, atol=1e-5), (neg_size, ref_neg_size)
    assert jnp.array_equal(sequences, ref_sequences), (sequences, ref_sequences)

    print("KERNEL_OK")
</pallas_src>

<mosaic_0001>
module attributes {stable_mosaic.version = 11 : i64} {
  func.func @_greedy_kernel(%arg0: i32, %arg1: memref<8x8x8xf32, #tpu.memory_space<vmem>>, %arg2: memref<8x8xi32, #tpu.memory_space<vmem>>, %arg3: memref<8x1xf32, #tpu.memory_space<vmem>>) attributes {dimension_semantics = [#tpu.dimension_semantics<parallel>], iteration_bounds = array<i64: 1>, scalar_prefetch = 0 : i64, scratch_operands = 0 : i64, tpu.core_type = #tpu.core_type<tc>, window_params = [{transform_indices = @transform_0, window_bounds = array<i64: 8, 8, 8>}, {transform_indices = @transform_1, window_bounds = array<i64: 8, 8>}, {transform_indices = @transform_2, window_bounds = array<i64: 8, 1>}]} {
    %0 = tpu.iota {dimensions = array<i32: 1>} : vector<8x8xi32>
    %false = arith.constant false
    %1 = vector.broadcast %false : i1 to vector<8x8xi1>
    %cst = arith.constant 0.000000e+00 : f32
    %2 = vector.broadcast %cst : f32 to vector<8x1xf32>
    %c0 = arith.constant 0 : index
    %c0_0 = arith.constant 0 : index
    %c0_1 = arith.constant 0 : index
    %3 = vector.load %arg1[%c0, %c0_0, %c0_1] : memref<8x8x8xf32, #tpu.memory_space<vmem>>, vector<8x1x8xf32>
    %4 = vector.shape_cast %3 : vector<8x1x8xf32> to vector<8x8xf32>
    %cst_2 = arith.constant -1.000000e+00 : f32
    %5 = vector.broadcast %cst_2 : f32 to vector<8x8xf32>
    %6 = arith.select %1, %5, %4 : vector<8x8xi1>, vector<8x8xf32>
    %cst_3 = arith.constant dense<0xFF800000> : vector<8xf32>
    %7 = vector.multi_reduction <maximumf>, %6, %cst_3 [1] : vector<8x8xf32> to vector<8xf32>
    %8 = vector.shape_cast %7 : vector<8xf32> to vector<8x1xf32>
    %9 = vector.broadcast %8 : vector<8x1xf32> to vector<8x8xf32>
    %10 = arith.cmpf oeq, %6, %9 : vector<8x8xf32>
    %c8_i32 = arith.constant 8 : i32
    %11 = vector.broadcast %c8_i32 : i32 to vector<8x8xi32>
    %12 = arith.select %10, %0, %11 : vector<8x8xi1>, vector<8x8xi32>
    %cst_4 = arith.constant dense<2147483647> : vector<8xi32>
    %13 = vector.multi_reduction <minsi>, %12, %cst_4 [1] : vector<8x8xi32> to vector<8xi32>
    %14 = vector.shape_cast %13 : vector<8xi32> to vector<8x1xi32>
    %cst_5 = arith.constant 0.000000e+00 : f32
    %15 = vector.broadcast %cst_5 : f32 to vector<8x1xf32>
    %16 = arith.cmpf ogt, %8, %15 : vector<8x1xf32>
    %c1_i32 = arith.constant 1 : i32
    %17 = vector.broadcast %c1_i32 : i32 to vector<8x1xi32>
    %18 = arith.addi %14, %17 : vector<8x1xi32>
    %c0_i32 = arith.constant 0 : i32
    %19 = vector.broadcast %c0_i32 : i32 to vector<8x1xi32>
    %20 = arith.select %16, %18, %19 : vector<8x1xi1>, vector<8x1xi32>
    %cst_6 = arith.constant 0.000000e+00 : f32
    %21 = vector.broadcast %cst_6 : f32 to vector<8x1xf32>
    %22 = arith.maximumf %8, %21 : vector<8x1xf32>
    %23 = arith.addf %2, %22 : vector<8x1xf32>
    %24 = vector.broadcast %14 : vector<8x1xi32> to vector<8x8xi32>
    %25 = arith.cmpi eq, %0, %24 : vector<8x8xi32>
    %26 = vector.broadcast %16 : vector<8x1xi1> to vector<8x8xi1>
    %27 = arith.andi %25, %26 : vector<8x8xi1>
    %28 = arith.ori %1, %27 : vector<8x8xi1>
    %c0_7 = arith.constant 0 : index
    %c0_8 = arith.constant 0 : index
    %29 = vector.load %arg2[%c0_7, %c0_8] : memref<8x8xi32, #tpu.memory_space<vmem>>, vector<8x1xi32>
    tpu.vector_store %arg2[%c0_7, %c0_8], %20 {strides = array<i32>} : memref<8x8xi32, #tpu.memory_space<vmem>>, vector<8x1xi32>,
    %c0_9 = arith.constant 0 : index
    %c1 = arith.constant 1 : index
    %c0_10 = arith.constant 0 : index
    %30 = vector.load %arg1[%c0_9, %c1, %c0_10] : memref<8x8x8xf32, #tpu.memory_space<vmem>>, vector<8x1x8xf32>
    %31 = vector.shape_cast %30 : vector<8x1x8xf32> to vector<8x8xf32>
    %cst_11 = arith.constant -1.000000e+00 : f32
    %32 = vector.broadcast %cst_11 : f32 to vector<8x8xf32>
    %33 = arith.select %28, %32, %31 : vector<8x8xi1>, vector<8x8xf32>
    %cst_12 = arith.constant dense<0xFF800000> : vector<8xf32>
    %34 = vector.multi_reduction <maximumf>, %33, %cst_12 [1] : vector<8x8xf32> to vector<8xf32>
    %35 = vector.shape_cast %34 : vector<8xf32> to vector<8x1xf32>
    %36 = vector.broadcast %35 : vector<8x1xf32> to vector<8x8xf32>
    %37 = arith.cmpf oeq, %33, %36 : vector<8x8xf32>
    %c8_i32_13 = arith.constant 8 : i32
    %38 = vector.broadcast %c8_i32_13 : i32 to vector<8x8xi32>
    %39 = arith.select %37, %0, %38 : vector<8x8xi1>, vector<8x8xi32>
    %cst_14 = arith.constant dense<2147483647> : vector<8xi32>
    %40 = vector.multi_reduction <minsi>, %39, %cst_14 [1] : vector<8x8xi32> to vector<8xi32>
    %41 = vector.shape_cast %40 : vector<8xi32> to vector<8x1xi32>
    %cst_15 = arith.constant 0.000000e+00 : f32
    %42 = vector.broadcast %cst_15 : f32 to vector<8x1xf32>
    %43 = arith.cmpf ogt, %35, %42 : vector<8x1xf32>
    %c1_i32_16 = arith.constant 1 : i32
    %44 = vector.broadcast %c1_i32_16 : i32 to vector<8x1xi32>
    %45 = arith.addi %41, %44 : vector<8x1xi32>
    %c0_i32_17 = arith.constant 0 : i32
    %46 = vector.broadcast %c0_i32_17 : i32 to vector<8x1xi32>
    %47 = arith.select %43, %45, %46 : vector<8x1xi1>, vector<8x1xi32>
    %cst_18 = arith.constant 0.000000e+00 : f32
    %48 = vector.broadcast %cst_18 : f32 to vector<8x1xf32>
    %49 = arith.maximumf %35, %48 : vector<8x1xf32>
    %50 = arith.addf %23, %49 : vector<8x1xf32>
    %51 = vector.broadcast %41 : vector<8x1xi32> to vector<8x8xi32>
    %52 = arith.cmpi eq, %0, %51 : vector<8x8xi32>
    %53 = vector.broadcast %43 : vector<8x1xi1> to vector<8x8xi1>
    %54 = arith.andi %52, %53 : vector<8x8xi1>
    %55 = arith.ori %28, %54 : vector<8x8xi1>
    %c0_19 = arith.constant 0 : index
    %c1_20 = arith.constant 1 : index
    %56 = vector.load %arg2[%c0_19, %c1_20] : memref<8x8xi32, #tpu.memory_space<vmem>>, vector<8x1xi32>
    tpu.vector_store %arg2[%c0_19, %c1_20], %47 {strides = array<i32>} : memref<8x8xi32, #tpu.memory_space<vmem>>, vector<8x1xi32>,
    %c0_21 = arith.constant 0 : index
    %c2 = arith.constant 2 : index
    %c0_22 = arith.constant 0 : index
    %57 = vector.load %arg1[%c0_21, %c2, %c0_22] : memref<8x8x8xf32, #tpu.memory_space<vmem>>, vector<8x1x8xf32>
    %58 = vector.shape_cast %57 : vector<8x1x8xf32> to vector<8x8xf32>
    %cst_23 = arith.constant -1.000000e+00 : f32
    %59 = vector.broadcast %cst_23 : f32 to vector<8x8xf32>
    %60 = arith.select %55, %59, %58 : vector<8x8xi1>, vector<8x8xf32>
    %cst_24 = arith.constant dense<0xFF800000> : vector<8xf32>
    %61 = vector.multi_reduction <maximumf>, %60, %cst_24 [1] : vector<8x8xf32> to vector<8xf32>
    %62 = vector.shape_cast %61 : vector<8xf32> to vector<8x1xf32>
    %63 = vector.broadcast %62 : vector<8x1xf32> to vector<8x8xf32>
    %64 = arith.cmpf oeq, %60, %63 : vector<8x8xf32>
    %c8_i32_25 = arith.constant 8 : i32
    %65 = vector.broadcast %c8_i32_25 : i32 to vector<8x8xi32>
    %66 = arith.select %64, %0, %65 : vector<8x8xi1>, vector<8x8xi32>
    %cst_26 = arith.constant dense<2147483647> : vector<8xi32>
    %67 = vector.multi_reduction <minsi>, %66, %cst_26 [1] : vector<8x8xi32> to vector<8xi32>
    %68 = vector.shape_cast %67 : vector<8xi32> to vector<8x1xi32>
    %cst_27 = arith.constant 0.000000e+00 : f32
    %69 = vector.broadcast %cst_27 : f32 to vector<8x1xf32>
    %70 = arith.cmpf ogt, %62, %69 : vector<8x1xf32>
    %c1_i32_28 = arith.constant 1 : i32
    %71 = vector.broadcast %c1_i32_28 : i32 to vector<8x1xi32>
    %72 = arith.addi %68, %71 : vector<8x1xi32>
    %c0_i32_29 = arith.constant 0 : i32
    %73 = vector.broadcast %c0_i32_29 : i32 to vector<8x1xi32>
    %74 = arith.select %70, %72, %73 : vector<8x1xi1>, vector<8x1xi32>
    %cst_30 = arith.constant 0.000000e+00 : f32
    %75 = vector.broadcast %cst_30 : f32 to vector<8x1xf32>
    %76 = arith.maximumf %62, %75 : vector<8x1xf32>
    %77 = arith.addf %50, %76 : vector<8x1xf32>
    %78 = vector.broadcast %68 : vector<8x1xi32> to vector<8x8xi32>
    %79 = arith.cmpi eq, %0, %78 : vector<8x8xi32>
    %80 = vector.broadcast %70 : vector<8x1xi1> to vector<8x8xi1>
    %81 = arith.andi %79, %80 : vector<8x8xi1>
    %82 = arith.ori %55, %81 : vector<8x8xi1>
    %c0_31 = arith.constant 0 : index
    %c2_32 = arith.constant 2 : index
    %83 = vector.load %arg2[%c0_31, %c2_32] : memref<8x8xi32, #tpu.memory_space<vmem>>, vector<8x1xi32>
    tpu.vector_store %arg2[%c0_31, %c2_32], %74 {strides = array<i32>} : memref<8x8xi32, #tpu.memory_space<vmem>>, vector<8x1xi32>,
    %c0_33 = arith.constant 0 : index
    %c3 = arith.constant 3 : index
    %c0_34 = arith.constant 0 : index
    %84 = vector.load %arg1[%c0_33, %c3, %c0_34] : memref<8x8x8xf32, #tpu.memory_space<vmem>>, vector<8x1x8xf32>
    %85 = vector.shape_cast %84 : vector<8x1x8xf32> to vector<8x8xf32>
    %cst_35 = arith.constant -1.000000e+00 : f32
    %86 = vector.broadcast %cst_35 : f32 to vector<8x8xf32>
    %87 = arith.select %82, %86, %85 : vector<8x8xi1>, vector<8x8xf32>
    %cst_36 = arith.constant dense<0xFF800000> : vector<8xf32>
    %88 = vector.multi_reduction <maximumf>, %87, %cst_36 [1] : vector<8x8xf32> to vector<8xf32>
    %89 = vector.shape_cast %88 : vector<8xf32> to vector<8x1xf32>
    %90 = vector.broadcast %89 : vector<8x1xf32> to vector<8x8xf32>
    %91 = arith.cmpf oeq, %87, %90 : vector<8x8xf32>
    %c8_i32_37 = arith.constant 8 : i32
    %92 = vector.broadcast %c8_i32_37 : i32 to vector<8x8xi32>
    %93 = arith.select %91, %0, %92 : vector<8x8xi1>, vector<8x8xi32>
    %cst_38 = arith.constant dense<2147483647> : vector<8xi32>
    %94 = vector.multi_reduction <minsi>, %93, %cst_38 [1] : vector<8x8xi32> to vector<8xi32>
    %95 = vector.shape_cast %94 : vector<8xi32> to vector<8x1xi32>
    %cst_39 = arith.constant 0.000000e+00 : f32
    %96 = vector.broadcast %cst_39 : f32 to vector<8x1xf32>
    %97 = arith.cmpf ogt, %89, %96 : vector<8x1xf32>
    %c1_i32_40 = arith.constant 1 : i32
    %98 = vector.broadcast %c1_i32_40 : i32 to vector<8x1xi32>
    %99 = arith.addi %95, %98 : vector<8x1xi32>
    %c0_i32_41 = arith.constant 0 : i32
    %100 = vector.broadcast %c0_i32_41 : i32 to vector<8x1xi32>
    %101 = arith.select %97, %99, %100 : vector<8x1xi1>, vector<8x1xi32>
    %cst_42 = arith.constant 0.000000e+00 : f32
    %102 = vector.broadcast %cst_42 : f32 to vector<8x1xf32>
    %103 = arith.maximumf %89, %102 : vector<8x1xf32>
    %104 = arith.addf %77, %103 : vector<8x1xf32>
    %105 = vector.broadcast %95 : vector<8x1xi32> to vector<8x8xi32>
    %106 = arith.cmpi eq, %0, %105 : vector<8x8xi32>
    %107 = vector.broadcast %97 : vector<8x1xi1> to vector<8x8xi1>
    %108 = arith.andi %106, %107 : vector<8x8xi1>
    %109 = arith.ori %82, %108 : vector<8x8xi1>
    %c0_43 = arith.constant 0 : index
    %c3_44 = arith.constant 3 : index
    %110 = vector.load %arg2[%c0_43, %c3_44] : memref<8x8xi32, #tpu.memory_space<vmem>>, vector<8x1xi32>
    tpu.vector_store %arg2[%c0_43, %c3_44], %101 {strides = array<i32>} : memref<8x8xi32, #tpu.memory_space<vmem>>, vector<8x1xi32>,
    %c0_45 = arith.constant 0 : index
    %c4 = arith.constant 4 : index
    %c0_46 = arith.constant 0 : index
    %111 = vector.load %arg1[%c0_45, %c4, %c0_46] : memref<8x8x8xf32, #tpu.memory_space<vmem>>, vector<8x1x8xf32>
    %112 = vector.shape_cast %111 : vector<8x1x8xf32> to vector<8x8xf32>
    %cst_47 = arith.constant -1.000000e+00 : f32
    %113 = vector.broadcast %cst_47 : f32 to vector<8x8xf32>
    %114 = arith.select %109, %113, %112 : vector<8x8xi1>, vector<8x8xf32>
    %cst_48 = arith.constant dense<0xFF800000> : vector<8xf32>
    %115 = vector.multi_reduction <maximumf>, %114, %cst_48 [1] : vector<8x8xf32> to vector<8xf32>
    %116 = vector.shape_cast %115 : vector<8xf32> to vector<8x1xf32>
    %117 = vector.broadcast %116 : vector<8x1xf32> to vector<8x8xf32>
    %118 = arith.cmpf oeq, %114, %117 : vector<8x8xf32>
    %c8_i32_49 = arith.constant 8 : i32
    %119 = vector.broadcast %c8_i32_49 : i32 to vector<8x8xi32>
    %120 = arith.select %118, %0, %119 : vector<8x8xi1>, vector<8x8xi32>
    %cst_50 = arith.constant dense<2147483647> : vector<8xi32>
    %121 = vector.multi_reduction <minsi>, %120, %cst_50 [1] : vector<8x8xi32> to vector<8xi32>
    %122 = vector.shape_cast %121 : vector<8xi32> to vector<8x1xi32>
    %cst_51 = arith.constant 0.000000e+00 : f32
    %123 = vector.broadcast %cst_51 : f32 to vector<8x1xf32>
    %124 = arith.cmpf ogt, %116, %123 : vector<8x1xf32>
    %c1_i32_52 = arith.constant 1 : i32
    %125 = vector.broadcast %c1_i32_52 : i32 to vector<8x1xi32>
    %126 = arith.addi %122, %125 : vector<8x1xi32>
    %c0_i32_53 = arith.constant 0 : i32
    %127 = vector.broadcast %c0_i32_53 : i32 to vector<8x1xi32>
    %128 = arith.select %124, %126, %127 : vector<8x1xi1>, vector<8x1xi32>
    %cst_54 = arith.constant 0.000000e+00 : f32
    %129 = vector.broadcast %cst_54 : f32 to vector<8x1xf32>
    %130 = arith.maximumf %116, %129 : vector<8x1xf32>
    %131 = arith.addf %104, %130 : vector<8x1xf32>
    %132 = vector.broadcast %122 : vector<8x1xi32> to vector<8x8xi32>
    %133 = arith.cmpi eq, %0, %132 : vector<8x8xi32>
    %134 = vector.broadcast %124 : vector<8x1xi1> to vector<8x8xi1>
    %135 = arith.andi %133, %134 : vector<8x8xi1>
    %136 = arith.ori %109, %135 : vector<8x8xi1>
    %c0_55 = arith.constant 0 : index
    %c4_56 = arith.constant 4 : index
    %137 = vector.load %arg2[%c0_55, %c4_56] : memref<8x8xi32, #tpu.memory_space<vmem>>, vector<8x1xi32>
    tpu.vector_store %arg2[%c0_55, %c4_56], %128 {strides = array<i32>} : memref<8x8xi32, #tpu.memory_space<vmem>>, vector<8x1xi32>,
    %c0_57 = arith.constant 0 : index
    %c5 = arith.constant 5 : index
    %c0_58 = arith.constant 0 : index
    %138 = vector.load %arg1[%c0_57, %c5, %c0_58] : memref<8x8x8xf32, #tpu.memory_space<vmem>>, vector<8x1x8xf32>
    %139 = vector.shape_cast %138 : vector<8x1x8xf32> to vector<8x8xf32>
    %cst_59 = arith.constant -1.000000e+00 : f32
    %140 = vector.broadcast %cst_59 : f32 to vector<8x8xf32>
    %141 = arith.select %136, %140, %139 : vector<8x8xi1>, vector<8x8xf32>
    %cst_60 = arith.constant dense<0xFF800000> : vector<8xf32>
    %142 = vector.multi_reduction <maximumf>, %141, %cst_60 [1] : vector<8x8xf32> to vector<8xf32>
    %143 = vector.shape_cast %142 : vector<8xf32> to vector<8x1xf32>
    %144 = vector.broadcast %143 : vector<8x1xf32> to vector<8x8xf32>
    %145 = arith.cmpf oeq, %141, %144 : vector<8x8xf32>
    %c8_i32_61 = arith.constant 8 : i32
    %146 = vector.broadcast %c8_i32_61 : i32 to vector<8x8xi32>
    %147 = arith.select %145, %0, %146 : vector<8x8xi1>, vector<8x8xi32>
    %cst_62 = arith.constant dense<2147483647> : vector<8xi32>
    %148 = vector.multi_reduction <minsi>, %147, %cst_62 [1] : vector<8x8xi32> to vector<8xi32>
    %149 = vector.shape_cast %148 : vector<8xi32> to vector<8x1xi32>
    %cst_63 = arith.constant 0.000000e+00 : f32
    %150 = vector.broadcast %cst_63 : f32 to vector<8x1xf32>
    %151 = arith.cmpf ogt, %143, %150 : vector<8x1xf32>
    %c1_i32_64 = arith.constant 1 : i32
    %152 = vector.broadcast %c1_i32_64 : i32 to vector<8x1xi32>
    %153 = arith.addi %149, %152 : vector<8x1xi32>
    %c0_i32_65 = arith.constant 0 : i32
    %154 = vector.broadcast %c0_i32_65 : i32 to vector<8x1xi32>
    %155 = arith.select %151, %153, %154 : vector<8x1xi1>, vector<8x1xi32>
    %cst_66 = arith.constant 0.000000e+00 : f32
    %156 = vector.broadcast %cst_66 : f32 to vector<8x1xf32>
    %157 = arith.maximumf %143, %156 : vector<8x1xf32>
    %158 = arith.addf %131, %157 : vector<8x1xf32>
    %159 = vector.broadcast %149 : vector<8x1xi32> to vector<8x8xi32>
    %160 = arith.cmpi eq, %0, %159 : vector<8x8xi32>
    %161 = vector.broadcast %151 : vector<8x1xi1> to vector<8x8xi1>
    %162 = arith.andi %160, %161 : vector<8x8xi1>
    %163 = arith.ori %136, %162 : vector<8x8xi1>
    %c0_67 = arith.constant 0 : index
    %c5_68 = arith.constant 5 : index
    %164 = vector.load %arg2[%c0_67, %c5_68] : memref<8x8xi32, #tpu.memory_space<vmem>>, vector<8x1xi32>
    tpu.vector_store %arg2[%c0_67, %c5_68], %155 {strides = array<i32>} : memref<8x8xi32, #tpu.memory_space<vmem>>, vector<8x1xi32>,
    %c0_69 = arith.constant 0 : index
    %c6 = arith.constant 6 : index
    %c0_70 = arith.constant 0 : index
    %165 = vector.load %arg1[%c0_69, %c6, %c0_70] : memref<8x8x8xf32, #tpu.memory_space<vmem>>, vector<8x1x8xf32>
    %166 = vector.shape_cast %165 : vector<8x1x8xf32> to vector<8x8xf32>
    %cst_71 = arith.constant -1.000000e+00 : f32
    %167 = vector.broadcast %cst_71 : f32 to vector<8x8xf32>
    %168 = arith.select %163, %167, %166 : vector<8x8xi1>, vector<8x8xf32>
    %cst_72 = arith.constant dense<0xFF800000> : vector<8xf32>
    %169 = vector.multi_reduction <maximumf>, %168, %cst_72 [1] : vector<8x8xf32> to vector<8xf32>
    %170 = vector.shape_cast %169 : vector<8xf32> to vector<8x1xf32>
    %171 = vector.broadcast %170 : vector<8x1xf32> to vector<8x8xf32>
    %172 = arith.cmpf oeq, %168, %171 : vector<8x8xf32>
    %c8_i32_73 = arith.constant 8 : i32
    %173 = vector.broadcast %c8_i32_73 : i32 to vector<8x8xi32>
    %174 = arith.select %172, %0, %173 : vector<8x8xi1>, vector<8x8xi32>
    %cst_74 = arith.constant dense<2147483647> : vector<8xi32>
    %175 = vector.multi_reduction <minsi>, %174, %cst_74 [1] : vector<8x8xi32> to vector<8xi32>
    %176 = vector.shape_cast %175 : vector<8xi32> to vector<8x1xi32>
    %cst_75 = arith.constant 0.000000e+00 : f32
    %177 = vector.broadcast %cst_75 : f32 to vector<8x1xf32>
    %178 = arith.cmpf ogt, %170, %177 : vector<8x1xf32>
    %c1_i32_76 = arith.constant 1 : i32
    %179 = vector.broadcast %c1_i32_76 : i32 to vector<8x1xi32>
    %180 = arith.addi %176, %179 : vector<8x1xi32>
    %c0_i32_77 = arith.constant 0 : i32
    %181 = vector.broadcast %c0_i32_77 : i32 to vector<8x1xi32>
    %182 = arith.select %178, %180, %181 : vector<8x1xi1>, vector<8x1xi32>
    %cst_78 = arith.constant 0.000000e+00 : f32
    %183 = vector.broadcast %cst_78 : f32 to vector<8x1xf32>
    %184 = arith.maximumf %170, %183 : vector<8x1xf32>
    %185 = arith.addf %158, %184 : vector<8x1xf32>
    %186 = vector.broadcast %176 : vector<8x1xi32> to vector<8x8xi32>
    %187 = arith.cmpi eq, %0, %186 : vector<8x8xi32>
    %188 = vector.broadcast %178 : vector<8x1xi1> to vector<8x8xi1>
    %189 = arith.andi %187, %188 : vector<8x8xi1>
    %190 = arith.ori %163, %189 : vector<8x8xi1>
    %c0_79 = arith.constant 0 : index
    %c6_80 = arith.constant 6 : index
    %191 = vector.load %arg2[%c0_79, %c6_80] : memref<8x8xi32, #tpu.memory_space<vmem>>, vector<8x1xi32>
    tpu.vector_store %arg2[%c0_79, %c6_80], %182 {strides = array<i32>} : memref<8x8xi32, #tpu.memory_space<vmem>>, vector<8x1xi32>,
    %c0_81 = arith.constant 0 : index
    %c7 = arith.constant 7 : index
    %c0_82 = arith.constant 0 : index
    %192 = vector.load %arg1[%c0_81, %c7, %c0_82] : memref<8x8x8xf32, #tpu.memory_space<vmem>>, vector<8x1x8xf32>
    %193 = vector.shape_cast %192 : vector<8x1x8xf32> to vector<8x8xf32>
    %cst_83 = arith.constant -1.000000e+00 : f32
    %194 = vector.broadcast %cst_83 : f32 to vector<8x8xf32>
    %195 = arith.select %190, %194, %193 : vector<8x8xi1>, vector<8x8xf32>
    %cst_84 = arith.constant dense<0xFF800000> : vector<8xf32>
    %196 = vector.multi_reduction <maximumf>, %195, %cst_84 [1] : vector<8x8xf32> to vector<8xf32>
    %197 = vector.shape_cast %196 : vector<8xf32> to vector<8x1xf32>
    %198 = vector.broadcast %197 : vector<8x1xf32> to vector<8x8xf32>
    %199 = arith.cmpf oeq, %195, %198 : vector<8x8xf32>
    %c8_i32_85 = arith.constant 8 : i32
    %200 = vector.broadcast %c8_i32_85 : i32 to vector<8x8xi32>
    %201 = arith.select %199, %0, %200 : vector<8x8xi1>, vector<8x8xi32>
    %cst_86 = arith.constant dense<2147483647> : vector<8xi32>
    %202 = vector.multi_reduction <minsi>, %201, %cst_86 [1] : vector<8x8xi32> to vector<8xi32>
    %203 = vector.shape_cast %202 : vector<8xi32> to vector<8x1xi32>
    %cst_87 = arith.constant 0.000000e+00 : f32
    %204 = vector.broadcast %cst_87 : f32 to vector<8x1xf32>
    %205 = arith.cmpf ogt, %197, %204 : vector<8x1xf32>
    %c1_i32_88 = arith.constant 1 : i32
    %206 = vector.broadcast %c1_i32_88 : i32 to vector<8x1xi32>
    %207 = arith.addi %203, %206 : vector<8x1xi32>
    %c0_i32_89 = arith.constant 0 : i32
    %208 = vector.broadcast %c0_i32_89 : i32 to vector<8x1xi32>
    %209 = arith.select %205, %207, %208 : vector<8x1xi1>, vector<8x1xi32>
    %cst_90 = arith.constant 0.000000e+00 : f32
    %210 = vector.broadcast %cst_90 : f32 to vector<8x1xf32>
    %211 = arith.maximumf %197, %210 : vector<8x1xf32>
    %212 = arith.addf %185, %211 : vector<8x1xf32>
    %c0_91 = arith.constant 0 : index
    %c7_92 = arith.constant 7 : index
    %213 = vector.load %arg2[%c0_91, %c7_92] : memref<8x8xi32, #tpu.memory_space<vmem>>, vector<8x1xi32>
    tpu.vector_store %arg2[%c0_91, %c7_92], %209 {strides = array<i32>} : memref<8x8xi32, #tpu.memory_space<vmem>>, vector<8x1xi32>,
    %cst_93 = arith.constant 0.000000e+00 : f32
    %214 = vector.broadcast %cst_93 : f32 to vector<8x1xf32>
    %215 = arith.subf %214, %212 : vector<8x1xf32>
    %c0_94 = arith.constant 0 : index
    %c0_95 = arith.constant 0 : index
    %216 = vector.load %arg3[%c0_94, %c0_95] : memref<8x1xf32, #tpu.memory_space<vmem>>, vector<8x1xf32>
    tpu.vector_store %arg3[%c0_94, %c0_95], %215 {strides = array<i32>} : memref<8x1xf32, #tpu.memory_space<vmem>>, vector<8x1xf32>,
    return
  }
  func.func @transform_0(%arg0: i32) -> (i32, i32, i32) {
    %c0_i32 = arith.constant 0 : i32
    %c0_i32_0 = arith.constant 0 : i32
    %c0_i32_1 = arith.constant 0 : i32
    return %arg0, %c0_i32, %c0_i32_0 : i32, i32, i32
  }
  func.func @transform_1(%arg0: i32) -> (i32, i32) {
    %c0_i32 = arith.constant 0 : i32
    %c0_i32_0 = arith.constant 0 : i32
    return %arg0, %c0_i32 : i32, i32
  }
  func.func @transform_2(%arg0: i32) -> (i32, i32) {
    %c0_i32 = arith.constant 0 : i32
    %c0_i32_0 = arith.constant 0 : i32
    return %arg0, %c0_i32 : i32, i32
  }
}

</mosaic_0001>

<bundles_post_ra>
// kernel: tpu_custom_call.1
= control target key start
LH: loop header
LB: loop body
LE: loop exit
PB: predicated region body
PF: predicated region fallthrough
CT: control target
= control target key end

     0   :  { %8 = vsyncpa [#allocation3], 0  ;;  %s952_s0 = inlined_call_operand.hbm [shape: f32[8,8,8], index: 0, kind: input, shape index: {}]   ;;  %s953_s1 = inlined_call_operand.hbm [shape: s32[8,8], index: 1, kind: output, shape index: {0}]   ;;  %s954_s2 = inlined_call_operand.vmem [shape: f32[8,1], index: 2, kind: output, shape index: {1}]  }
   0x1   :  { %9 = vsyncpa [#allocation4], 0  ;;  %s657_s9 = smov [#allocation2]   ;;  %s609_s13 = scalar_lea.hbm %s952_s0, 1024 }
   0x2   :  { %s15_s10 = sshll.u32 %s657_s9, 4  ;;  %p610_p0 = scmp.ne.s32.totalorder %s952_s0, %s609_s13  ;;  %s16_s10 = int_to_ptr.vmem [resolvable:$true] %s15_s10 }
   0x3   :  { %p613_p1 = scmp.lt.u32.totalorder %s609_s13, %s952_s0 }
   0x5   :  { %p615_p2 = pnand %p613_p1, %p610_p0 }
   0x7   :  { %618 = shalt.err (!%p615_p2)
}
   0x8   :  { %s619_s18 = scalar_lea.vmem %s16_s10, 1024  ;;  %p624_p4 = scmp.lt.s32.totalorder %s16_s10, %s16_s10 }
   0x9   :  { %p620_p3 = scmp.ne.s32.totalorder %s16_s10, %s619_s18  ;;  %p625_p5 = scmp.lt.s32.totalorder %s619_s18, %s619_s18 }
   0xb   :  { %p626_p6 = por %p625_p5, %p624_p4 }
   0xd   :  { %p627_p7 = pnand %p626_p6, %p620_p3 }
   0xf   :  { %630 = shalt.err (!%p627_p7)
}
  0x10   :  { %s658_s19 = smov 128   ;;  %s659_s20 = smov 8  }
  0x11   :  { %21 = dma.hbm_to_vmem [thread:$0]  %s952_s0, 1024, %s16_s10, [#allocation3], %s658_s19, %s658_s19, %s659_s20  }
  0x12   :  { %653 = dma.done.wait [#allocation3], 1024  }
  0x13   :  { %654 = vsyncadd [#allocation3], 4294966272  ;;  %vm44_vm0 = vcmask 1041409   ;;  %v27_v0 = vld [vmem:[#allocation2] sm:$0x1]  ;;  %vm47_vm1 = vcmask 1042434   ;;  %v25_v23 = vlaneseq }
  0x14   :  { %v28_v1 = vld [vmem:[#allocation2 + $0x8] sm:$0x1]  ;;  %v29_v2 = vld [vmem:[#allocation2 + $0x10] sm:$0x1]  ;;  %v30_v3 = vld [vmem:[#allocation2 + $0x18] sm:$0x1] }
  0x15   :  { %v31_v4 = vld [vmem:[#allocation2 + $0x20] sm:$0x1]  ;;  %v32_v5 = vld [vmem:[#allocation2 + $0x28] sm:$0x1]  ;;  %v33_v6 = vld [vmem:[#allocation2 + $0x30] sm:$0x1] }
  0x16   :  { %v43_v7 = vrot.slane %v28_v1, 7  ;;  %v46_v8 = vrot.slane %v29_v2, 6  ;;  %v34_v9 = vld [vmem:[#allocation2 + $0x38] sm:$0x1]  ;;  %v49_v10 = vrot.slane %v30_v3, 5  ;;  %vm50_vm2 = vcmask 1043459  }
  0x17   :  { %v52_v11 = vrot.slane %v31_v4, 4  ;;  %vm53_vm3 = vcmask 1044484   ;;  %v55_v13 = vrot.slane %v32_v5, 3  ;;  %vm56_vm4 = vcmask 1045509   ;;  %s660_s24 = smov [#allocation5]  }
  0x18   :  { %v45_v12 = vsel %vm44_vm0, %v43_v7, %v27_v0  ;;  %v58_v15 = vrot.slane %v33_v6, 2  ;;  %vm59_vm5 = vcmask 1046534   ;;  %v61_v17 = vrot.slane %v34_v9, 1  ;;  %v144_v7 = vld [vmem:[#allocation2 + $0x19] sm:$0x1]  ;;  %s592_s25 = sshll.u32 %s660_s24, 4  ;;  %s593_s25 = int_to_ptr.vmem [resolvable:$true] %s592_s25 }
  0x19   :  { %v48_v14 = vsel %vm47_vm1, %v46_v8, %v45_v12  ;;  %vm62_vm6 = vcmask 1047559   ;;  %vm65_vm7 = vcmask 64512   ;;  %v702_v29 = vand.u32 127, %v25_v23  ;;  %p636_p9 = scmp.lt.s32.totalorder %s593_s25, %s593_s25 }
  0x1a   :  { %v51_v16 = vsel %vm50_vm2, %v49_v10, %v48_v14  ;;  %v145_v10 = vld [vmem:[#allocation2 + $0x21] sm:$0x1] }
  0x1b   :  { %v54_v18 = vsel %vm53_vm3, %v52_v11, %v51_v16  ;;  %v161_v11 = vrot.slane %v144_v7, 5  ;;  %v163_v14 = vrot.slane %v145_v10, 4  ;;  %v147_v16 = vld [vmem:[#allocation2 + $0x31] sm:$0x1]  ;;  %v337_v10 = vld [vmem:[#allocation2 + $0x24] sm:$0x1] }
  0x1c   :  { %v57_v19 = vsel %vm56_vm4, %v55_v13, %v54_v18  ;;  %v146_v13 = vld [vmem:[#allocation2 + $0x29] sm:$0x1] }
  0x1d   :  { %v60_v20 = vsel %vm59_vm5, %v58_v15, %v57_v19 }
  0x1e   :  { %v63_v21 = vsel %vm62_vm6, %v61_v17, %v60_v20  ;;  %v165_v17 = vrot.slane %v146_v13, 3  ;;  %v148_v20 = vld [vmem:[#allocation2 + $0x39] sm:$0x1] }
  0x1f   :  { %v66_v22 = vsel %vm65_vm7, %v63_v21, -inf  ;;  %v167_v21 = vrot.slane %v147_v16, 2 }
  0x20   :  { %67 = vmax.xlane.f32.xlu0 %v66_v22 }
  0xad   :  { %v696_v24 = vpop.xlane.xlu0 %67 }
  0xae   :  { %v70_v25 = vrot.slane %v696_v24, 1  ;;  %v71_v26 = vrot.slane %v696_v24, 2  ;;  %v72_v27 = vrot.slane %v696_v24, 3  ;;  %v73_v28 = vrot.slane %v696_v24, 4 }
  0xaf   :  { %v74_v30 = vrot.slane %v696_v24, 5  ;;  %v75_v31 = vrot.slane %v696_v24, 6  ;;  %v76_v32 = vrot.slane %v696_v24, 7  ;;  %vm85_vm12 = vcmp.eq.f32.partialorder %v27_v0, %v696_v24 }
  0xb0   :  { %vm86_vm8 = vcmp.eq.f32.partialorder %v28_v1, %v70_v25  ;;  %vm87_vm9 = vcmp.eq.f32.partialorder %v29_v2, %v71_v26  ;;  %vm707_vm10 = vcmp.eq.f32.partialorder %v30_v3, %v72_v27  ;;  %vm711_vm11 = vcmp.eq.f32.partialorder %v31_v4, %v73_v28  ;;  %v142_v3 = vld [vmem:[#allocation2 + $0x9] sm:$0x1]  ;;  %v143_v4 = vld [vmem:[#allocation2 + $0x11] sm:$0x1] }
  0xb1   :  { %vm716_vm13 = vcmp.eq.f32.partialorder %v32_v5, %v74_v30  ;;  %vm720_vm14 = vcmp.eq.f32.partialorder %v33_v6, %v75_v31  ;;  %v94_v37 = vsel %vm86_vm8, %v702_v29, 8  ;;  %v95_v38 = vsel %vm87_vm9, %v702_v29, 8  ;;  %v141_v6 = vld [vmem:[#allocation2 + $0x1] sm:$0x1] }
  0xb2   :  { %v96_v39 = vsel %vm707_vm10, %v702_v29, 8  ;;  %vm729_vm15 = vcmp.eq.f32.partialorder %v34_v9, %v76_v32  ;;  %v97_v41 = vsel %vm711_vm11, %v702_v29, 8  ;;  %v101_v42 = vrot.slane %v94_v37, 7 }
  0xb3   :  { %v93_v43 = vsel %vm85_vm12, %v702_v29, 8  ;;  %v98_v44 = vsel %vm716_vm13, %v702_v29, 8  ;;  %v103_v45 = vrot.slane %v95_v38, 6  ;;  %v99_v46 = vsel %vm720_vm14, %v702_v29, 8 }
  0xb4   :  { %v102_v47 = vsel %vm44_vm0, %v101_v42, %v93_v43  ;;  %v105_v48 = vrot.slane %v96_v39, 5  ;;  %v100_v49 = vsel %vm729_vm15, %v702_v29, 8  ;;  %v107_v51 = vrot.slane %v97_v41, 4 }
  0xb5   :  { %v104_v50 = vsel %vm47_vm1, %v103_v45, %v102_v47  ;;  %v109_v53 = vrot.slane %v98_v44, 3  ;;  %v111_v55 = vrot.slane %v99_v46, 2  ;;  %v113_v57 = vrot.slane %v100_v49, 1  ;;  %v206_v46 = vld [vmem:[#allocation2 + $0xa] sm:$0x1] }
  0xb6   :  { %v106_v52 = vsel %vm50_vm2, %v105_v48, %v104_v50  ;;  %v157_v5 = vrot.slane %v142_v3, 7  ;;  %v159_v8 = vrot.slane %v143_v4, 6  ;;  %v169_v25 = vrot.slane %v148_v20, 1  ;;  %v207_v47 = vld [vmem:[#allocation2 + $0x12] sm:$0x1] }
  0xb7   :  { %v108_v54 = vsel %vm53_vm3, %v107_v51, %v106_v52  ;;  %vm130_vm9 = vcmp.gt.f32.partialorder %v696_v24, 0.0  ;;  %vm955_vm11 = vcmask 7168   ;;  %v221_v48 = vrot.slane %v206_v46, 7  ;;  %v205_v49 = vld [vmem:[#allocation2 + $0x2] sm:$0x1] }
  0xb8   :  { %v110_v56 = vsel %vm56_vm4, %v109_v53, %v108_v54  ;;  %v158_v9 = vsel %vm44_vm0, %v157_v5, %v141_v6  ;;  %v208_v50 = vld [vmem:[#allocation2 + $0x1a] sm:$0x1]  ;;  %v223_v51 = vrot.slane %v207_v47, 6  ;;  %v209_v53 = vld [vmem:[#allocation2 + $0x22] sm:$0x1] }
  0xb9   :  { %v112_v58 = vsel %vm59_vm5, %v111_v55, %v110_v56  ;;  %v160_v12 = vsel %vm47_vm1, %v159_v8, %v158_v9  ;;  %v222_v52 = vsel %vm44_vm0, %v221_v48, %v205_v49  ;;  %v225_v54 = vrot.slane %v208_v50, 5  ;;  %v210_v56 = vld [vmem:[#allocation2 + $0x2a] sm:$0x1] }
  0xba   :  { %v114_v59 = vsel %vm62_vm6, %v113_v57, %v112_v58  ;;  %v162_v15 = vsel %vm50_vm2, %v161_v11, %v160_v12  ;;  %v224_v55 = vsel %vm47_vm1, %v223_v51, %v222_v52  ;;  %v227_v57 = vrot.slane %v209_v53, 4 }
  0xbb   :  { %v115_v60 = vsel %vm65_vm7, %v114_v59, 2147483647  ;;  %v164_v18 = vsel %vm53_vm3, %v163_v14, %v162_v15  ;;  %v226_v58 = vsel %vm50_vm2, %v225_v54, %v224_v55  ;;  %v211_v59 = vld [vmem:[#allocation2 + $0x32] sm:$0x1] }
  0xbc   :  { %v117_v61 = vshra.s32 %v115_v60, 16  ;;  %v116_v63 = vand.u32 65535, %v115_v60  ;;  %v166_v22 = vsel %vm56_vm4, %v165_v17, %v164_v18  ;;  %v229_v60 = vrot.slane %v210_v56, 3 }
  0xbd   :  { %v168_v28 = vsel %vm59_vm5, %v167_v21, %v166_v22 }
  0xbe   :  { %v119_v62 = vcvt.s32.f32 %v117_v61  ;;  %v118_v1 = vcvt.s32.f32 %v116_v63  ;;  %v170_v31 = vsel %vm62_vm6, %v169_v25, %v168_v28  ;;  %v228_v61 = vsel %vm53_vm3, %v227_v57, %v226_v58  ;;  %v212_v63 = vld [vmem:[#allocation2 + $0x3a] sm:$0x1]  ;;  %v271_v25 = vld [vmem:[#allocation2 + $0x13] sm:$0x1]  ;;  %v272_v28 = vld [vmem:[#allocation2 + $0x1b] sm:$0x1] }
  0xbf   :  { %v233_v5 = vrot.slane %v212_v63, 1 }
  0xc0   :  { %120 = vmin.xlane.f32.xlu0 %v119_v62 }
 0x14d   :  { %v121_v0 = vpop.xlane.xlu0 %120 }
 0x14e   :  { %vm122_vm8 = vcmp.eq.f32.partialorder %v119_v62, %v121_v0  ;;  %v127_v19 = vcvt.f32.s32 %v121_v0  ;;  %v231_v0 = vrot.slane %v211_v59, 2 }
 0x14f   :  { %v123_v2 = vsel %vm122_vm8, %v118_v1, inf  ;;  %v230_v1 = vsel %vm56_vm4, %v229_v60, %v228_v61  ;;  %vm203_vm8 = vcmask 15368  }
 0x150   :  { %124 = vmin.xlane.f32.xlu1 %v123_v2  ;;  %v128_v26 = vshll.u32 %v127_v19, 16  ;;  %v232_v6 = vsel %vm59_vm5, %v231_v0, %v230_v1 }
 0x151   :  { %v234_v9 = vsel %vm62_vm6, %v233_v5, %v232_v6  ;;  %v333_v6 = vld [vmem:[#allocation2 + $0x4] sm:$0x1] }
 0x1dd   :  { %v125_v23 = vpop.xlane.xlu1 %124 }
 0x1de   :  { %v126_v27 = vcvt.f32.s32 %v125_v23  ;;  %v270_v23 = vld [vmem:[#allocation2 + $0xb] sm:$0x1] }
 0x1e0   :  { %v129_v30 = vadd.s32 %v128_v26, %v126_v27  ;;  %v285_v26 = vrot.slane %v270_v23, 7  ;;  %v269_v27 = vld [vmem:[#allocation2 + $0x3] sm:$0x1] }
 0x1e2   :  { %v131_v32 = vadd.s32 1, %v129_v30  ;;  %vm135_vm10 = vcmp.eq.s32.totalorder %v702_v29, %v129_v30  ;;  %v287_v30 = vrot.slane %v271_v25, 6 }
 0x1e3   :  { %vm763_vm12 = vmand %vm135_vm10, %vm130_vm9 }
 0x1e4   :  { %v172_v34 = vsel %vm763_vm12, -1.0, %v170_v31  ;;  %v132_v35 = vsel %vm130_vm9, %v131_v32, 0  ;;  %v286_v31 = vsel %vm44_vm0, %v285_v26, %v269_v27  ;;  %v273_v32 = vld [vmem:[#allocation2 + $0x23] sm:$0x1] }
 0x1e5   :  { %v173_v36 = vsel %vm65_vm7, %v172_v34, -inf  ;;  %140 = vst.msk [vmem:[#allocation5] sm:$0xff] %vm955_vm11, %v132_v35  ;;  %v288_v35 = vsel %vm47_vm1, %v287_v30, %v286_v31 }
 0x1e6   :  { %174 = vmax.xlane.f32.xlu1 %v173_v36  ;;  %v274_v36 = vld [vmem:[#allocation2 + $0x2b] sm:$0x1] }
 0x273   :  { %v771_v37 = vpop.xlane.xlu1 %174 }
 0x274   :  { %vm176_vm13 = vcmp.eq.f32.partialorder %v172_v34, %v771_v37  ;;  %vm193_vm15 = vcmp.gt.f32.partialorder %v771_v37, 0.0  ;;  %v289_v34 = vrot.slane %v272_v28, 5 }
 0x275   :  { %v177_v38 = vsel %vm176_vm13, %v702_v29, 8 }
 0x276   :  { %v178_v39 = vsel %vm65_vm7, %v177_v38, 2147483647  ;;  %v291_v38 = vrot.slane %v273_v32, 4 }
 0x277   :  { %v180_v40 = vshra.s32 %v178_v39, 16  ;;  %v179_v42 = vand.u32 65535, %v178_v39  ;;  %v290_v39 = vsel %vm50_vm2, %v289_v34, %v288_v35 }
 0x279   :  { %v182_v41 = vcvt.s32.f32 %v180_v40  ;;  %v181_v44 = vcvt.s32.f32 %v179_v42  ;;  %v275_v40 = vld [vmem:[#allocation2 + $0x33] sm:$0x1]  ;;  %v292_v42 = vsel %vm53_vm3, %v291_v38, %v290_v39 }
 0x27b   :  { %183 = vmin.xlane.f32.xlu0 %v182_v41 }
 0x308   :  { %v184_v43 = vpop.xlane.xlu0 %183 }
 0x309   :  { %vm185_vm14 = vcmp.eq.f32.partialorder %v182_v41, %v184_v43  ;;  %v190_v62 = vcvt.f32.s32 %v184_v43  ;;  %v293_v41 = vrot.slane %v274_v36, 3 }
 0x30a   :  { %v186_v45 = vsel %vm185_vm14, %v181_v44, inf  ;;  %v276_v44 = vld [vmem:[#allocation2 + $0x3b] sm:$0x1] }
 0x30b   :  { %187 = vmin.xlane.f32.xlu1 %v186_v45  ;;  %v191_v3 = vshll.u32 %v190_v62, 16  ;;  %v295_v45 = vrot.slane %v275_v40, 2  ;;  %v294_v46 = vsel %vm56_vm4, %v293_v41, %v292_v42  ;;  %v297_v50 = vrot.slane %v276_v44, 1 }
 0x30d   :  { %v296_v51 = vsel %vm59_vm5, %v295_v45, %v294_v46 }
 0x30e   :  { %v298_v54 = vsel %vm62_vm6, %v297_v50, %v296_v51  ;;  %v399_v50 = vld [vmem:[#allocation2 + $0x15] sm:$0x1] }
 0x398   :  { %v188_v2 = vpop.xlane.xlu1 %187 }
 0x399   :  { %v189_v4 = vcvt.f32.s32 %v188_v2 }
 0x39b   :  { %v192_v7 = vadd.s32 %v191_v3, %v189_v4  ;;  %v334_v3 = vld [vmem:[#allocation2 + $0xc] sm:$0x1]  ;;  %v335_v4 = vld [vmem:[#allocation2 + $0x14] sm:$0x1] }
 0x39c   :  { %v349_v5 = vrot.slane %v334_v3, 7  ;;  %v404_v3 = vld [vmem:[#allocation2 + $0x3d] sm:$0x1] }
 0x39d   :  { %v194_v8 = vadd.s32 1, %v192_v7  ;;  %vm198_vm9 = vcmp.eq.s32.totalorder %v702_v29, %v192_v7  ;;  %v336_v7 = vld [vmem:[#allocation2 + $0x1c] sm:$0x1] }
 0x39e   :  { %vm785_vm10 = vmand %vm198_vm9, %vm193_vm15  ;;  %vm267_vm9 = vcmask 23568  }
 0x39f   :  { %v195_v11 = vsel %vm193_vm15, %v194_v8, 0  ;;  %vm202_vm13 = vmor %vm763_vm12, %vm785_vm10  ;;  %v351_v8 = vrot.slane %v335_v4, 6 }
 0x3a0   :  { %204 = vst.msk [vmem:[#allocation5] sm:$0xff] %vm203_vm8, %v195_v11  ;;  %v236_v12 = vsel %vm202_vm13, -1.0, %v234_v9  ;;  %v350_v9 = vsel %vm44_vm0, %v349_v5, %v333_v6  ;;  %v353_v11 = vrot.slane %v336_v7, 5 }
 0x3a1   :  { %v237_v13 = vsel %vm65_vm7, %v236_v12, -inf }
 0x3a2   :  { %238 = vmax.xlane.f32.xlu0 %v237_v13  ;;  %v338_v13 = vld [vmem:[#allocation2 + $0x2c] sm:$0x1] }
 0x42f   :  { %v799_v14 = vpop.xlane.xlu0 %238 }
 0x430   :  { %vm240_vm14 = vcmp.eq.f32.partialorder %v236_v12, %v799_v14  ;;  %vm257_vm8 = vcmp.gt.f32.partialorder %v799_v14, 0.0  ;;  %v352_v12 = vsel %vm47_vm1, %v351_v8, %v350_v9  ;;  %v425_v9 = vrot.slane %v404_v3, 1 }
 0x431   :  { %v241_v15 = vsel %vm240_vm14, %v702_v29, 8 }
 0x432   :  { %v242_v16 = vsel %vm65_vm7, %v241_v15, 2147483647  ;;  %v355_v15 = vrot.slane %v337_v10, 4 }
 0x433   :  { %v244_v17 = vshra.s32 %v242_v16, 16  ;;  %v243_v19 = vand.u32 65535, %v242_v16  ;;  %v354_v16 = vsel %vm50_vm2, %v353_v11, %v352_v12 }
 0x435   :  { %v246_v18 = vcvt.s32.f32 %v244_v17  ;;  %v245_v21 = vcvt.s32.f32 %v243_v19  ;;  %v339_v17 = vld [vmem:[#allocation2 + $0x34] sm:$0x1]  ;;  %v356_v19 = vsel %vm53_vm3, %v355_v15, %v354_v16 }
 0x437   :  { %247 = vmin.xlane.f32.xlu1 %v246_v18 }
 0x4c4   :  { %v248_v20 = vpop.xlane.xlu1 %247 }
 0x4c5   :  { %vm249_vm15 = vcmp.eq.f32.partialorder %v246_v18, %v248_v20  ;;  %v254_v43 = vcvt.f32.s32 %v248_v20  ;;  %v357_v18 = vrot.slane %v338_v13, 3 }
 0x4c6   :  { %v250_v22 = vsel %vm249_vm15, %v245_v21, inf  ;;  %v340_v21 = vld [vmem:[#allocation2 + $0x3c] sm:$0x1] }
 0x4c7   :  { %251 = vmin.xlane.f32.xlu0 %v250_v22  ;;  %v255_v48 = vshll.u32 %v254_v43, 16  ;;  %v359_v22 = vrot.slane %v339_v17, 2  ;;  %v358_v23 = vsel %vm56_vm4, %v357_v18, %v356_v19  ;;  %v361_v28 = vrot.slane %v340_v21, 1 }
 0x4c9   :  { %v360_v30 = vsel %vm59_vm5, %v359_v22, %v358_v23 }
 0x4ca   :  { %v362_v34 = vsel %vm62_vm6, %v361_v28, %v360_v30  ;;  %v462_v28 = vld [vmem:[#allocation2 + $0xe] sm:$0x1]  ;;  %v463_v30 = vld [vmem:[#allocation2 + $0x16] sm:$0x1] }
 0x4cb   :  { %v479_v35 = vrot.slane %v463_v30, 6 }
 0x554   :  { %v252_v47 = vpop.xlane.xlu0 %251 }
 0x555   :  { %v253_v49 = vcvt.f32.s32 %v252_v47 }
 0x557   :  { %v256_v52 = vadd.s32 %v255_v48, %v253_v49  ;;  %v398_v49 = vld [vmem:[#allocation2 + $0xd] sm:$0x1] }
 0x558   :  { %v413_v51 = vrot.slane %v398_v49, 7  ;;  %v468_v49 = vld [vmem:[#allocation2 + $0x3e] sm:$0x1] }
 0x559   :  { %v258_v53 = vadd.s32 1, %v256_v52  ;;  %vm262_vm14 = vcmp.eq.s32.totalorder %v702_v29, %v256_v52  ;;  %v397_v52 = vld [vmem:[#allocation2 + $0x5] sm:$0x1] }
 0x55a   :  { %vm265_vm15 = vmand %vm262_vm14, %vm257_vm8 }
 0x55b   :  { %v259_v55 = vsel %vm257_vm8, %v258_v53, 0  ;;  %vm818_vm11 = vmor %vm202_vm13, %vm265_vm15  ;;  %vm331_vm13 = vcmask 31768   ;;  %v400_v53 = vld [vmem:[#allocation2 + $0x1d] sm:$0x1] }
 0x55c   :  { %268 = vst.msk [vmem:[#allocation5] sm:$0xff] %vm267_vm9, %v259_v55  ;;  %v300_v57 = vsel %vm818_vm11, -1.0, %v298_v54  ;;  %v415_v54 = vrot.slane %v399_v50, 6  ;;  %v414_v55 = vsel %vm44_vm0, %v413_v51, %v397_v52 }
 0x55d   :  { %v301_v58 = vsel %vm65_vm7, %v300_v57, -inf }
 0x55e   :  { %302 = vmax.xlane.f32.xlu1 %v301_v58  ;;  %v417_v58 = vrot.slane %v400_v53, 5 }
 0x5eb   :  { %v825_v59 = vpop.xlane.xlu1 %302 }
 0x5ec   :  { %vm304_vm8 = vcmp.eq.f32.partialorder %v300_v57, %v825_v59  ;;  %vm321_vm10 = vcmp.gt.f32.partialorder %v825_v59, 0.0  ;;  %v401_v57 = vld [vmem:[#allocation2 + $0x25] sm:$0x1] }
 0x5ed   :  { %v305_v33 = vsel %vm304_vm8, %v702_v29, 8 }
 0x5ee   :  { %v306_v60 = vsel %vm65_vm7, %v305_v33, 2147483647  ;;  %v416_v33 = vsel %vm47_vm1, %v415_v54, %v414_v55  ;;  %v489_v55 = vrot.slane %v468_v49, 1  ;;  %v133_v49 = vmax.f32 %v696_v24, 0.0 }
 0x5ef   :  { %v308_v61 = vshra.s32 %v306_v60, 16  ;;  %v307_v63 = vand.u32 65535, %v306_v60  ;;  %v402_v60 = vld [vmem:[#allocation2 + $0x2d] sm:$0x1] }
 0x5f1   :  { %v310_v62 = vcvt.s32.f32 %v308_v61  ;;  %v309_v1 = vcvt.s32.f32 %v307_v63  ;;  %v419_v61 = vrot.slane %v401_v57, 4  ;;  %v403_v63 = vld [vmem:[#allocation2 + $0x35] sm:$0x1] }
 0x5f2   :  { %v423_v4 = vrot.slane %v403_v63, 2 }
 0x5f3   :  { %311 = vmin.xlane.f32.xlu0 %v310_v62 }
 0x680   :  { %v312_v0 = vpop.xlane.xlu0 %311 }
 0x681   :  { %vm313_vm12 = vcmp.eq.f32.partialorder %v310_v62, %v312_v0  ;;  %v318_v20 = vcvt.f32.s32 %v312_v0  ;;  %v418_v62 = vsel %vm50_vm2, %v417_v58, %v416_v33  ;;  %v421_v0 = vrot.slane %v402_v60, 3 }
 0x682   :  { %v314_v2 = vsel %vm313_vm12, %v309_v1, inf  ;;  %v420_v1 = vsel %vm53_vm3, %v419_v61, %v418_v62 }
 0x683   :  { %315 = vmin.xlane.f32.xlu1 %v314_v2  ;;  %v319_v26 = vshll.u32 %v318_v20, 16  ;;  %v422_v5 = vsel %vm56_vm4, %v421_v0, %v420_v1 }
 0x684   :  { %v424_v10 = vsel %vm59_vm5, %v423_v4, %v422_v5 }
 0x685   :  { %v426_v13 = vsel %vm62_vm6, %v425_v9, %v424_v10  ;;  %v526_v10 = vld [vmem:[#allocation2 + $0xf] sm:$0x1] }
 0x710   :  { %v316_v25 = vpop.xlane.xlu1 %315 }
 0x711   :  { %v317_v27 = vcvt.f32.s32 %v316_v25 }
 0x713   :  { %v320_v31 = vadd.s32 %v319_v26, %v317_v27 }
 0x715   :  { %v322_v32 = vadd.s32 1, %v320_v31  ;;  %vm326_vm9 = vcmp.eq.s32.totalorder %v702_v29, %v320_v31  ;;  %v477_v31 = vrot.slane %v462_v28, 7 }
 0x716   :  { %vm839_vm14 = vmand %vm326_vm9, %vm321_vm10 }
 0x717   :  { %v323_v36 = vsel %vm321_vm10, %v322_v32, 0  ;;  %vm330_vm15 = vmor %vm818_vm11, %vm839_vm14  ;;  %v461_v32 = vld [vmem:[#allocation2 + $0x6] sm:$0x1] }
 0x718   :  { %332 = vst.msk [vmem:[#allocation5] sm:$0xff] %vm331_vm13, %v323_v36  ;;  %v364_v38 = vsel %vm330_vm15, -1.0, %v362_v34  ;;  %vm395_vm13 = vcmask 39968   ;;  %v464_v34 = vld [vmem:[#allocation2 + $0x1e] sm:$0x1]  ;;  %v478_v36 = vsel %vm44_vm0, %v477_v31, %v461_v32 }
 0x719   :  { %v365_v39 = vsel %vm65_vm7, %v364_v38, -inf  ;;  %v532_v31 = vld [vmem:[#allocation2 + $0x3f] sm:$0x1] }
 0x71a   :  { %366 = vmax.xlane.f32.xlu0 %v365_v39  ;;  %v481_v39 = vrot.slane %v464_v34, 5 }
 0x7a7   :  { %v853_v40 = vpop.xlane.xlu0 %366 }
 0x7a8   :  { %vm368_vm8 = vcmp.eq.f32.partialorder %v364_v38, %v853_v40  ;;  %vm385_vm10 = vcmp.gt.f32.partialorder %v853_v40, 0.0  ;;  %v465_v38 = vld [vmem:[#allocation2 + $0x26] sm:$0x1]  ;;  %v388_v16 = vmax.f32 %v853_v40, 0.0 }
 0x7a9   :  { %v369_v41 = vsel %vm368_vm8, %v702_v29, 8 }
 0x7aa   :  { %v370_v42 = vsel %vm65_vm7, %v369_v41, 2147483647  ;;  %v480_v41 = vsel %vm47_vm1, %v479_v35, %v478_v36 }
 0x7ab   :  { %v372_v43 = vshra.s32 %v370_v42, 16  ;;  %v371_v45 = vand.u32 65535, %v370_v42  ;;  %v466_v42 = vld [vmem:[#allocation2 + $0x2e] sm:$0x1] }
 0x7ad   :  { %v374_v44 = vcvt.s32.f32 %v372_v43  ;;  %v373_v47 = vcvt.s32.f32 %v371_v45  ;;  %v483_v43 = vrot.slane %v465_v38, 4  ;;  %v467_v45 = vld [vmem:[#allocation2 + $0x36] sm:$0x1] }
 0x7ae   :  { %v487_v50 = vrot.slane %v467_v45, 2 }
 0x7af   :  { %375 = vmin.xlane.f32.xlu1 %v374_v44 }
 0x83c   :  { %v376_v46 = vpop.xlane.xlu1 %375 }
 0x83d   :  { %vm377_vm12 = vcmp.eq.f32.partialorder %v374_v44, %v376_v46  ;;  %v382_v2 = vcvt.f32.s32 %v376_v46  ;;  %v482_v44 = vsel %vm50_vm2, %v481_v39, %v480_v41  ;;  %v485_v46 = vrot.slane %v466_v42, 3 }
 0x83e   :  { %v378_v48 = vsel %vm377_vm12, %v373_v47, inf  ;;  %v484_v47 = vsel %vm53_vm3, %v483_v43, %v482_v44  ;;  %v553_v39 = vrot.slane %v532_v31, 1 }
 0x83f   :  { %379 = vmin.xlane.f32.xlu0 %v378_v48  ;;  %v383_v7 = vshll.u32 %v382_v2, 16  ;;  %v486_v51 = vsel %vm56_vm4, %v485_v46, %v484_v47 }
 0x840   :  { %v488_v57 = vsel %vm59_vm5, %v487_v50, %v486_v51  ;;  %v260_v50 = vmax.f32 %v799_v14, 0.0 }
 0x841   :  { %v490_v60 = vsel %vm62_vm6, %v489_v55, %v488_v57 }
 0x8cc   :  { %v380_v6 = vpop.xlane.xlu0 %379 }
 0x8cd   :  { %v381_v8 = vcvt.f32.s32 %v380_v6 }
 0x8cf   :  { %v384_v11 = vadd.s32 %v383_v7, %v381_v8 }
 0x8d1   :  { %v386_v12 = vadd.s32 1, %v384_v11  ;;  %vm390_vm9 = vcmp.eq.s32.totalorder %v702_v29, %v384_v11  ;;  %v527_v11 = vld [vmem:[#allocation2 + $0x17] sm:$0x1] }
 0x8d2   :  { %vm393_vm8 = vmand %vm390_vm9, %vm385_vm10 }
 0x8d3   :  { %v387_v15 = vsel %vm385_vm10, %v386_v12, 0  ;;  %vm872_vm12 = vmor %vm330_vm15, %vm393_vm8  ;;  %v541_v12 = vrot.slane %v526_v10, 7 }
 0x8d4   :  { %396 = vst.msk [vmem:[#allocation5] sm:$0xff] %vm395_vm13, %v387_v15  ;;  %v428_v17 = vsel %vm872_vm12, -1.0, %v426_v13  ;;  %vm459_vm13 = vcmask 48168   ;;  %v525_v13 = vld [vmem:[#allocation2 + $0x7] sm:$0x1] }
 0x8d5   :  { %v429_v18 = vsel %vm65_vm7, %v428_v17, -inf  ;;  %v528_v15 = vld [vmem:[#allocation2 + $0x1f] sm:$0x1] }
 0x8d6   :  { %430 = vmax.xlane.f32.xlu1 %v429_v18  ;;  %v542_v18 = vsel %vm44_vm0, %v541_v12, %v525_v13 }
 0x963   :  { %v879_v19 = vpop.xlane.xlu1 %430 }
 0x964   :  { %vm432_vm10 = vcmp.eq.f32.partialorder %v428_v17, %v879_v19  ;;  %vm449_vm14 = vcmp.gt.f32.partialorder %v879_v19, 0.0  ;;  %v543_v17 = vrot.slane %v527_v11, 6  ;;  %v452_v55 = vmax.f32 %v879_v19, 0.0 }
 0x965   :  { %v433_v56 = vsel %vm432_vm10, %v702_v29, 8 }
 0x966   :  { %v434_v20 = vsel %vm65_vm7, %v433_v56, 2147483647  ;;  %v529_v56 = vld [vmem:[#allocation2 + $0x27] sm:$0x1] }
 0x967   :  { %v436_v21 = vshra.s32 %v434_v20, 16  ;;  %v435_v23 = vand.u32 65535, %v434_v20  ;;  %v545_v20 = vrot.slane %v528_v15, 5 }
 0x969   :  { %v438_v22 = vcvt.s32.f32 %v436_v21  ;;  %v437_v26 = vcvt.s32.f32 %v435_v23  ;;  %v544_v21 = vsel %vm47_vm1, %v543_v17, %v542_v18  ;;  %v547_v23 = vrot.slane %v529_v56, 4 }
 0x96b   :  { %439 = vmin.xlane.f32.xlu0 %v438_v22 }
 0x9f8   :  { %v440_v25 = vpop.xlane.xlu0 %439 }
 0x9f9   :  { %vm441_vm11 = vcmp.eq.f32.partialorder %v438_v22, %v440_v25  ;;  %v446_v48 = vcvt.f32.s32 %v440_v25  ;;  %v530_v22 = vld [vmem:[#allocation2 + $0x2f] sm:$0x1]  ;;  %v546_v25 = vsel %vm50_vm2, %v545_v20, %v544_v21  ;;  %vm523_vm2 = vcmask 56368  }
 0x9fa   :  { %v442_v27 = vsel %vm441_vm11, %v437_v26, inf  ;;  %v531_v26 = vld [vmem:[#allocation2 + $0x37] sm:$0x1]  ;;  %v548_v28 = vsel %vm53_vm3, %v547_v23, %v546_v25 }
 0x9fb   :  { %443 = vmin.xlane.f32.xlu1 %v442_v27  ;;  %v447_v53 = vshll.u32 %v446_v48, 16  ;;  %v549_v27 = vrot.slane %v530_v22, 3  ;;  %v551_v32 = vrot.slane %v531_v26, 2  ;;  %v196_v48 = vmax.f32 %v771_v37, 0.0 }
 0x9fd   :  { %v550_v34 = vsel %vm56_vm4, %v549_v27, %v548_v28  ;;  %v197_v51 = vadd.f32 %v196_v48, %v133_v49 }
 0x9fe   :  { %v552_v41 = vsel %vm59_vm5, %v551_v32, %v550_v34 }
 0x9ff   :  { %v554_v44 = vsel %vm62_vm6, %v553_v39, %v552_v41  ;;  %vm978_vm6 = vcmask 7168  }
 0xa88   :  { %v444_v52 = vpop.xlane.xlu1 %443 }
 0xa89   :  { %v445_v54 = vcvt.f32.s32 %v444_v52  ;;  %v324_v52 = vmax.f32 %v825_v59, 0.0 }
 0xa8b   :  { %v448_v58 = vadd.s32 %v447_v53, %v445_v54  ;;  %v261_v53 = vadd.f32 %v260_v50, %v197_v51 }
 0xa8d   :  { %v450_v33 = vadd.s32 1, %v448_v58  ;;  %vm454_vm15 = vcmp.eq.s32.totalorder %v702_v29, %v448_v58  ;;  %v325_v54 = vadd.f32 %v324_v52, %v261_v53 }
 0xa8e   :  { %vm893_vm9 = vmand %vm454_vm15, %vm449_vm14 }
 0xa8f   :  { %v451_v62 = vsel %vm449_vm14, %v450_v33, 0  ;;  %vm458_vm8 = vmor %vm872_vm12, %vm893_vm9  ;;  %v389_v57 = vadd.f32 %v388_v16, %v325_v54 }
 0xa90   :  { %v492_v63 = vsel %vm458_vm8, -1.0, %v490_v60  ;;  %460 = vst.msk [vmem:[#allocation5] sm:$0xff] %vm459_vm13, %v451_v62 }
 0xa91   :  { %v493_v0 = vsel %vm65_vm7, %v492_v63, -inf  ;;  %v453_v33 = vadd.f32 %v452_v55, %v389_v57 }
 0xa92   :  { %494 = vmax.xlane.f32.xlu0 %v493_v0 }
 0xb1f   :  { %v907_v1 = vpop.xlane.xlu0 %494 }
 0xb20   :  { %vm496_vm10 = vcmp.eq.f32.partialorder %v492_v63, %v907_v1  ;;  %vm513_vm0 = vcmp.gt.f32.partialorder %v907_v1, 0.0  ;;  %v516_v58 = vmax.f32 %v907_v1, 0.0 }
 0xb21   :  { %v497_v2 = vsel %vm496_vm10, %v702_v29, 8 }
 0xb22   :  { %v498_v3 = vsel %vm65_vm7, %v497_v2, 2147483647  ;;  %v517_v61 = vadd.f32 %v516_v58, %v453_v33 }
 0xb23   :  { %v500_v4 = vshra.s32 %v498_v3, 16  ;;  %v499_v6 = vand.u32 65535, %v498_v3 }
 0xb25   :  { %v502_v5 = vcvt.s32.f32 %v500_v4  ;;  %v501_v8 = vcvt.s32.f32 %v499_v6 }
 0xb27   :  { %503 = vmin.xlane.f32.xlu1 %v502_v5 }
 0xbb4   :  { %v504_v7 = vpop.xlane.xlu1 %503 }
 0xbb5   :  { %vm505_vm11 = vcmp.eq.f32.partialorder %v502_v5, %v504_v7  ;;  %v510_v30 = vcvt.f32.s32 %v504_v7 }
 0xbb6   :  { %v506_v9 = vsel %vm505_vm11, %v501_v8, inf }
 0xbb7   :  { %507 = vmin.xlane.f32.xlu0 %v506_v9  ;;  %v511_v36 = vshll.u32 %v510_v30, 16 }
 0xc44   :  { %v508_v35 = vpop.xlane.xlu0 %507 }
 0xc45   :  { %v509_v38 = vcvt.f32.s32 %v508_v35 }
 0xc47   :  { %v512_v42 = vadd.s32 %v511_v36, %v509_v38 }
 0xc49   :  { %v514_v43 = vadd.s32 1, %v512_v42  ;;  %vm518_vm1 = vcmp.eq.s32.totalorder %v702_v29, %v512_v42 }
 0xc4a   :  { %vm521_vm3 = vmand %vm518_vm1, %vm513_vm0 }
 0xc4b   :  { %v515_v45 = vsel %vm513_vm0, %v514_v43, 0  ;;  %vm522_vm4 = vmor %vm458_vm8, %vm521_vm3 }
 0xc4c   :  { %v556_v46 = vsel %vm522_vm4, -1.0, %v554_v44  ;;  %524 = vst.msk [vmem:[#allocation5] sm:$0xff] %vm523_vm2, %v515_v45 }
 0xc4d   :  { %v557_v47 = vsel %vm65_vm7, %v556_v46, -inf }
 0xc4e   :  { %558 = vmax.xlane.f32.xlu1 %v557_v47 }
 0xcdb   :  { %v559_v60 = vpop.xlane.xlu1 %558 }
 0xcdc   :  { %vm560_vm5 = vcmp.eq.f32.partialorder %v556_v46, %v559_v60  ;;  %v580_v37 = vmax.f32 %v559_v60, 0.0  ;;  %vm577_vm14 = vcmp.gt.f32.partialorder %v559_v60, 0.0 }
 0xcdd   :  { %v561_v24 = vsel %vm560_vm5, %v702_v29, 8 }
 0xcde   :  { %v581_v14 = vadd.f32 %v580_v37, %v517_v61  ;;  %v562_v62 = vsel %vm65_vm7, %v561_v24, 2147483647  ;;  %vm582_vm7 = vcmask 64568  }
 0xcdf   :  { %v564_v59 = vshra.s32 %v562_v62, 16  ;;  %v563_v40 = vand.u32 65535, %v562_v62 }
 0xce0   :  { %v584_v63 = vsub.f32 0.0, %v581_v14 }
 0xce1   :  { %v566_v0 = vcvt.s32.f32 %v564_v59  ;;  %v565_v1 = vcvt.s32.f32 %v563_v40 }
 0xce2   :  { %585 = vst.msk [vmem:[%s954_s2] sm:$0xff] %vm978_vm6, %v584_v63  ;;  %s631_s2 = scalar_lea.vmem %s593_s25, 128 }
 0xce3   :  { %567 = vmin.xlane.f32.xlu0 %v566_v0  ;;  %p632_p8 = scmp.ne.s32.totalorder %s593_s25, %s631_s2  ;;  %p637_p10 = scmp.lt.s32.totalorder %s631_s2, %s631_s2 }
 0xce5   :  { %p638_p11 = por %p637_p10, %p636_p9 }
 0xce7   :  { %p639_p12 = pnand %p638_p11, %p632_p8 }
 0xd70   :  { %v568_v19 = vpop.xlane.xlu0 %567 }
 0xd71   :  { %vm569_vm12 = vcmp.eq.f32.partialorder %v566_v0, %v568_v19  ;;  %v574_v3 = vcvt.f32.s32 %v568_v19 }
 0xd72   :  { %v570_v2 = vsel %vm569_vm12, %v565_v1, inf }
 0xd73   :  { %571 = vmin.xlane.f32.xlu1 %v570_v2  ;;  %v575_v4 = vshll.u32 %v574_v3, 16 }
 0xe00   :  { %v572_v29 = vpop.xlane.xlu1 %571 }
 0xe01   :  { %v573_v5 = vcvt.f32.s32 %v572_v29 }
 0xe03   :  { %v576_v6 = vadd.s32 %v575_v4, %v573_v5 }
 0xe05   :  { %v578_v7 = vadd.s32 1, %v576_v6 }
 0xe07   :  { %v579_v8 = vsel %vm577_vm14, %v578_v7, 0 }
 0xe08   :  { %583 = vst.msk [vmem:[#allocation5] sm:$0xff] %vm582_vm7, %v579_v8 }
 0xe09   :  { %642 = shalt.err (!%p639_p12)
}
 0xe0a   :  { %s643_s28 = scalar_lea.hbm %s953_s1, 128 }
 0xe0b   :  { %p644_p13 = scmp.ne.s32.totalorder %s953_s1, %s643_s28  ;;  %p647_p0 = scmp.lt.u32.totalorder %s643_s28, %s953_s1 }
 0xe0d   :  { %p649_p1 = pnand %p647_p0, %p644_p13 }
 0xe0f   :  { %652 = shalt.err (!%p649_p1)
}
 0xe10   :  { %595 = dma.vmem_to_hbm [thread:$0]  %s593_s25, 128, %s953_s1, [#allocation4]  }
 0xe11   :  { %655 = dma.done.wait [#allocation4], 128  }
 0xe12   :  { %656 = vsyncadd [#allocation4], 4294967168 }
 0xe13   :  { %603 = vsyncpa [#allocation3], 1 }
 0xe14   :  { %604 = vsyncpa [#allocation4], 1 }

</bundles_post_ra>
